<compile_context>
chip_gen: v7x
topology: tpu7x:2x2x1
jax: 0.10.0
libtpu: 0.0.40
codegen_flags: <defaults>
</compile_context>

<pallas_src>
import functools

import jax
import jax.numpy as jnp
from jax.experimental import pallas as pl
from jax.experimental.pallas import tpu as pltpu

_LANE = 128
_TB = 128                      # batch tile: fills the MXU M dimension
_NEG_SLOPE = 0.01              # torch.nn.functional.leaky_relu default


def _leaky_relu(x):
    # VPU-friendly: one mul + one max (no compare/select pair).
    return jnp.maximum(x, x * jnp.asarray(_NEG_SLOPE, x.dtype))


def _round_up(x, m):
    return ((x + m - 1) // m) * m


def _bf16_epilogue_default():
    """bf16 bias/activation epilogue only on chips with a bf16 VPU (v6e/v7x)."""
    try:
        kind = jax.devices()[0].device_kind.lower()
    except Exception:
        return False
    for old in ("v2", "v3", "v4", "v5"):
        if old in kind:
            return False
    return ("tpu" in kind) or ("v6" in kind) or ("v7" in kind)


# --------------------------------------------------------------------------
# Kernel: one batch tile per grid step; all packed weights VMEM-resident.
# --------------------------------------------------------------------------
def dueling_q_kernel(x_ref, w1_ref, w23_ref, w4_ref, b_ref, q_ref, psum_ref, *,
                     n_output, b_valid, tile_b, fuse_mean, need_row_mask,
                     bf16_epilogue):
    ep = jnp.bfloat16 if bf16_epilogue else jnp.float32

    def dense(h_bf16, w, bias_row):
        acc = jnp.dot(h_bf16, w, preferred_element_type=jnp.float32)
        z = acc.astype(ep) + bias_row.astype(ep)
        return _leaky_relu(z).astype(jnp.bfloat16)

    x = x_ref[...].astype(jnp.bfloat16)

    # 3 hidden layers; advantage|value streams packed block-diagonally into
    # one 128-lane stream (extra lanes are exact zeros end to end).
    h = dense(x, w1_ref[...], b_ref[0:1, :])
    h = dense(h, w23_ref[0], b_ref[1:2, :])
    h = dense(h, w23_ref[1], b_ref[2:3, :])

    # Head: cols [0:n_output] = advantage, col n_output = value, rest zero.
    head = jnp.dot(h, w4_ref[...], preferred_element_type=jnp.float32)
    head = head + b_ref[3:4, :]                           # f32 combine path

    value = head[:, n_output:n_output + 1]                # (TB, 1)

    # Padded columns are exact zeros -> full-vreg lane reduce gives adv + value.
    adv_row = jnp.sum(head, axis=-1, keepdims=True) - value   # (TB, 1)

    if need_row_mask:
        tile_start = pl.program_id(0) * tile_b
        row_ids = jax.lax.broadcasted_iota(jnp.int32, adv_row.shape, 0) + tile_start
        adv_row = jnp.where(row_ids < b_valid, adv_row, 0.0)
    adv_partial = jnp.sum(adv_row, keepdims=True)         # (1, 1)

    q = value + head                                      # dueling combine
    if fuse_mean:
        # Single tile: fully fused GLOBAL mean (matches torch advantage.mean()).
        q = q - adv_partial * (1.0 / (b_valid * n_output))

    if n_output < q.shape[-1]:
        # Zero junk columns so the padded (B,128) output is safe to consume.
        col_ids = jax.lax.broadcasted_iota(jnp.int32, q.shape, 1)
        q = jnp.where(col_ids < n_output, q, 0.0)

    q_ref[...] = q.astype(q_ref.dtype)
    psum_ref[...] = jnp.broadcast_to(adv_partial, psum_ref.shape).astype(psum_ref.dtype)


# --------------------------------------------------------------------------
# Wrapper
# --------------------------------------------------------------------------
def dueling_q_forward(x, packed):
    """x: (B, n_input) f32. packed: output of pack_params (pack once, reuse)."""
    n_output = packed["n_output"]
    bf16_epilogue = packed["bf16_epilogue"]
    b_valid, n_input = x.shape
    assert n_input == packed["w1"].shape[0]

    # Batch tiling: fill the MXU M dimension; pad to a multiple of 16 so the
    # bf16-cast activations fill packed sublanes.
    tb = _TB if b_valid >= _TB else _round_up(max(b_valid, 1), 16)
    b_pad = _round_up(b_valid, tb)
    num_tiles = b_pad // tb
    fuse_mean = num_tiles == 1

    if b_pad != b_valid:
        x = jnp.pad(x, ((0, b_pad - b_valid), (0, 0)))

    operands = (x, packed["w1"], packed["w23"], packed["w4"], packed["b"])

    grid_spec = pltpu.PrefetchScalarGridSpec(
        num_scalar_prefetch=0,
        grid=(num_tiles,),
        in_specs=[
            pl.BlockSpec((tb, n_input), lambda i: (i, 0)),
            pl.BlockSpec((n_input, _LANE), lambda i: (0, 0)),       # resident
            pl.BlockSpec((2, _LANE, _LANE), lambda i: (0, 0, 0)),   # resident
            pl.BlockSpec((_LANE, _LANE), lambda i: (0, 0)),         # resident
            pl.BlockSpec((4, _LANE), lambda i: (0, 0)),             # resident
        ],
        out_specs=[
            pl.BlockSpec((tb, _LANE), lambda i: (i, 0)),
            pl.BlockSpec((8, _LANE), lambda i: (i, 0)),             # per-tile partials
        ],
    )

    flops = 2 * b_pad * (n_input * _LANE + 3 * _LANE * _LANE)
    bytes_accessed = (sum(int(a.nbytes) for a in operands)
                      + b_pad * _LANE * 4 + num_tiles * 8 * _LANE * 4)
    cost = pl.CostEstimate(flops=flops, transcendentals=0,
                           bytes_accessed=bytes_accessed)

    kernel = functools.partial(
        dueling_q_kernel,
        n_output=n_output, b_valid=b_valid, tile_b=tb,
        fuse_mean=fuse_mean, need_row_mask=(b_pad != b_valid),
        bf16_epilogue=bf16_epilogue)

    q_pad, psum = pl.pallas_call(
        kernel,
        out_shape=(jax.ShapeDtypeStruct((b_pad, _LANE), jnp.float32),
                   jax.ShapeDtypeStruct((num_tiles * 8, _LANE), jnp.float32)),
        grid_spec=grid_spec,
        cost_estimate=cost,
        compiler_params=pltpu.CompilerParams(
            dimension_semantics=("parallel",)),
    )(*operands)

    if fuse_mean:
        # Padded columns/rows are clean zeros / unused; downstream could read
        # the (b_pad, 128) buffer directly (e.g. Q(s,a) via one-hot dot).
        return q_pad[:b_valid, :n_output]

    # Two-pass GLOBAL mean: tiny wrapper-side AXPY over the valid region only.
    adv_mean = jnp.sum(psum[::8, 0]) / (b_valid * n_output)
    return q_pad[:b_valid, :n_output] - adv_mean


# --------------------------------------------------------------------------
# Parameter init (PyTorch nn.Linear-style) and one-time packing.
# --------------------------------------------------------------------------
def init_params(key, n_input, n_hidden, n_output):
    def linear(key, fan_in, fan_out):
        kw, kb = jax.random.split(key)
        bound = 1.0 / jnp.sqrt(fan_in)
        w = jax.random.uniform(kw, (fan_in, fan_out), jnp.float32, -bound, bound)
        b = jax.random.uniform(kb, (1, fan_out), jnp.float32, -bound, bound)
        return w, b

    keys = jax.random.split(key, 8)
    p = {}
    p["aw1"], p["ab1"] = linear(keys[0], n_input, n_hidden)
    p["aw2"], p["ab2"] = linear(keys[1], n_hidden, n_hidden)
    p["aw3"], p["ab3"] = linear(keys[2], n_hidden, n_hidden)
    p["aw4"], p["ab4"] = linear(keys[3], n_hidden, n_output)
    p["vw1"], p["vb1"] = linear(keys[4], n_input, n_hidden)
    p["vw2"], p["vb2"] = linear(keys[5], n_hidden, n_hidden)
    p["vw3"], p["vb3"] = linear(keys[6], n_hidden, n_hidden)
    p["vw4"], p["vb4"] = linear(keys[7], n_hidden, 1)
    return p


def pack_params(raw, n_input, n_hidden, n_output, *, bf16_epilogue=None):
    """Pack the 8 Linear layers into 4 fused, 128-lane operands. Pack once."""
    H = n_hidden
    H2 = 2 * n_hidden
    # TODO(synk): tile the hidden / output streams if they ever exceed one
    # 128-lane MXU pass (2*n_hidden > 128 or n_output + 1 > 128).
    assert H2 <= _LANE and n_output + 1 <= _LANE

    if bf16_epilogue is None:
        bf16_epilogue = _bf16_epilogue_default()

    def block_diag_pad(a, v):
        out = jnp.zeros((_LANE, _LANE), jnp.float32)
        out = out.at[:H, :H].set(a)
        out = out.at[H:H2, H:H2].set(v)
        return out

    w1 = jnp.zeros((n_input, _LANE), jnp.float32)
    w1 = w1.at[:, :H].set(raw["aw1"]).at[:, H:H2].set(raw["vw1"])

    w23 = jnp.stack([block_diag_pad(raw["aw2"], raw["vw2"]),
                     block_diag_pad(raw["aw3"], raw["vw3"])])

    w4 = jnp.zeros((_LANE, _LANE), jnp.float32)
    w4 = w4.at[:H, :n_output].set(raw["aw4"])
    w4 = w4.at[H:H2, n_output:n_output + 1].set(raw["vw4"])

    b = jnp.zeros((4, _LANE), jnp.float32)
    b = b.at[0, :H].set(raw["ab1"][0]).at[0, H:H2].set(raw["vb1"][0])
    b = b.at[1, :H].set(raw["ab2"][0]).at[1, H:H2].set(raw["vb2"][0])
    b = b.at[2, :H].set(raw["ab3"][0]).at[2, H:H2].set(raw["vb3"][0])
    b = b.at[3, :n_output].set(raw["ab4"][0])
    b = b.at[3, n_output].set(raw["vb4"][0, 0])

    return {
        "w1": w1.astype(jnp.bfloat16),
        "w23": w23.astype(jnp.bfloat16),
        "w4": w4.astype(jnp.bfloat16),
        "b": b,                           # biases stay f32 (cast per-use)
        "n_output": n_output,
        "bf16_epilogue": bool(bf16_epilogue),
    }


# --------------------------------------------------------------------------
# References for sanity checking.
# --------------------------------------------------------------------------
def _mlp_ref(x, w1, b1, w2, b2, w3, b3, w4, b4, *, bf16_weights, ep_dtype):
    def dot(a, w):
        if bf16_weights:
            a = a.astype(jnp.bfloat16)
            w = w.astype(jnp.bfloat16)
        return jnp.dot(a, w, preferred_element_type=jnp.float32)

    def act(acc, bias):
        z = acc.astype(ep_dtype) + bias.astype(ep_dtype)
        return _leaky_relu(z)

    h = act(dot(x, w1), b1)
    h = act(dot(h, w2), b2)
    h = act(dot(h, w3), b3)
    return dot(h, w4) + b4


def _reference(x, p, *, bf16_weights, ep_dtype):
    adv = _mlp_ref(x, p["aw1"], p["ab1"], p["aw2"], p["ab2"],
                   p["aw3"], p["ab3"], p["aw4"], p["ab4"],
                   bf16_weights=bf16_weights, ep_dtype=ep_dtype)
    val = _mlp_ref(x, p["vw1"], p["vb1"], p["vw2"], p["vb2"],
                   p["vw3"], p["vb3"], p["vw4"], p["vb4"],
                   bf16_weights=bf16_weights, ep_dtype=ep_dtype)
    return val + adv - jnp.mean(adv)        # GLOBAL mean, like torch .mean()


if __name__ == "__main__":
    n_input, n_hidden, n_output = 16, 32, 4

    key = jax.random.PRNGKey(0)
    kx1, kx2, kp = jax.random.split(key, 3)

    raw = init_params(kp, n_input, n_hidden, n_output)
    packed = pack_params(raw, n_input, n_hidden, n_output)   # pack ONCE, reuse
    ep = jnp.bfloat16 if packed["bf16_epilogue"] else jnp.float32

    # Case 1: batch fills the MXU M dim -> single fused grid step.
    B1 = 128
    x1 = jax.random.normal(kx1, (B1, n_input), dtype=jnp.float32)
    out1 = jax.block_until_ready(dueling_q_forward(x1, packed))
    assert out1.shape == (B1, n_output)

    ref1 = _reference(x1, raw, bf16_weights=True, ep_dtype=ep)
    assert jnp.allclose(out1, ref1, atol=5e-2, rtol=5e-2), (
        f"mismatch vs mixed-precision ref: {jnp.max(jnp.abs(out1 - ref1))}")
    ref1_f32 = _reference(x1, raw, bf16_weights=False, ep_dtype=jnp.float32)
    assert jnp.allclose(out1, ref1_f32, atol=2e-1, rtol=2e-1), (
        f"mismatch vs f32 ref: {jnp.max(jnp.abs(out1 - ref1_f32))}")

    # Case 2: ragged batch -> padded rows + multi-tile grid + two-pass mean.
    B2 = 200
    x2 = jax.random.normal(kx2, (B2, n_input), dtype=jnp.float32)
    out2 = jax.block_until_ready(dueling_q_forward(x2, packed))
    assert out2.shape == (B2, n_output)
    ref2 = _reference(x2, raw, bf16_weights=True, ep_dtype=ep)
    assert jnp.allclose(out2, ref2, atol=5e-2, rtol=5e-2), (
        f"mismatch vs mixed-precision ref (tiled): {jnp.max(jnp.abs(out2 - ref2))}")

    print("KERNEL_OK")
</pallas_src>

<mosaic_0001>
module attributes {stable_mosaic.version = 11 : i64} {
  func.func @dueling_q_kernel(%arg0: i32, %arg1: memref<128x16xf32, #tpu.memory_space<vmem>>, %arg2: memref<16x128xbf16, #tpu.memory_space<vmem>>, %arg3: memref<2x128x128xbf16, #tpu.memory_space<vmem>>, %arg4: memref<128x128xbf16, #tpu.memory_space<vmem>>, %arg5: memref<4x128xf32, #tpu.memory_space<vmem>>, %arg6: memref<128x128xf32, #tpu.memory_space<vmem>>, %arg7: memref<8x128xf32, #tpu.memory_space<vmem>>) attributes {dimension_semantics = [#tpu.dimension_semantics<parallel>], iteration_bounds = array<i64: 1>, scalar_prefetch = 0 : i64, scratch_operands = 0 : i64, tpu.core_type = #tpu.core_type<tc>, window_params = [{transform_indices = @transform_0, window_bounds = array<i64: 128, 16>}, {pipeline_mode = #tpu.pipeline_mode<synchronous>, transform_indices = @transform_1, window_bounds = array<i64: 16, 128>}, {pipeline_mode = #tpu.pipeline_mode<synchronous>, transform_indices = @transform_2, window_bounds = array<i64: 2, 128, 128>}, {pipeline_mode = #tpu.pipeline_mode<synchronous>, transform_indices = @transform_3, window_bounds = array<i64: 128, 128>}, {pipeline_mode = #tpu.pipeline_mode<synchronous>, transform_indices = @transform_4, window_bounds = array<i64: 4, 128>}, {transform_indices = @transform_5, window_bounds = array<i64: 128, 128>}, {transform_indices = @transform_6, window_bounds = array<i64: 8, 128>}]} {
    %c0 = arith.constant 0 : index
    %c0_0 = arith.constant 0 : index
    %0 = vector.load %arg1[%c0, %c0_0] : memref<128x16xf32, #tpu.memory_space<vmem>>, vector<128x16xf32>
    %1 = arith.truncf %0 : vector<128x16xf32> to vector<128x16xbf16>
    %c0_1 = arith.constant 0 : index
    %c0_2 = arith.constant 0 : index
    %2 = vector.load %arg2[%c0_1, %c0_2] : memref<16x128xbf16, #tpu.memory_space<vmem>>, vector<16x128xbf16>
    %c0_3 = arith.constant 0 : index
    %c0_4 = arith.constant 0 : index
    %3 = vector.load %arg5[%c0_3, %c0_4] : memref<4x128xf32, #tpu.memory_space<vmem>>, vector<1x128xf32>
    %cst = arith.constant dense<0.000000e+00> : vector<128x128xf32>
    %4 = tpu.matmul %1, %2, %cst {dimension_numbers = #tpu.dot_dimension_numbers<[1], [0], [0], [1], [0, 0, 1, 1], [], []>} : vector<128x16xbf16>, vector<16x128xbf16>, vector<128x128xf32> -> vector<128x128xf32>
    %5 = vector.broadcast %3 : vector<1x128xf32> to vector<128x128xf32>
    %6 = arith.addf %4, %5 : vector<128x128xf32>
    %cst_5 = arith.constant 0.00999999977 : f32
    %7 = vector.broadcast %cst_5 : f32 to vector<128x128xf32>
    %8 = arith.mulf %6, %7 : vector<128x128xf32>
    %9 = arith.maximumf %6, %8 : vector<128x128xf32>
    %10 = arith.truncf %9 : vector<128x128xf32> to vector<128x128xbf16>
    %c0_6 = arith.constant 0 : index
    %c0_7 = arith.constant 0 : index
    %c0_8 = arith.constant 0 : index
    %11 = vector.load %arg3[%c0_6, %c0_7, %c0_8] : memref<2x128x128xbf16, #tpu.memory_space<vmem>>, vector<1x128x128xbf16>
    %12 = vector.shape_cast %11 : vector<1x128x128xbf16> to vector<128x128xbf16>
    %c1 = arith.constant 1 : index
    %c0_9 = arith.constant 0 : index
    %13 = vector.load %arg5[%c1, %c0_9] : memref<4x128xf32, #tpu.memory_space<vmem>>, vector<1x128xf32>
    %cst_10 = arith.constant dense<0.000000e+00> : vector<128x128xf32>
    %14 = tpu.matmul %10, %12, %cst_10 {dimension_numbers = #tpu.dot_dimension_numbers<[1], [0], [0], [1], [0, 0, 1, 1], [], []>} : vector<128x128xbf16>, vector<128x128xbf16>, vector<128x128xf32> -> vector<128x128xf32>
    %15 = vector.broadcast %13 : vector<1x128xf32> to vector<128x128xf32>
    %16 = arith.addf %14, %15 : vector<128x128xf32>
    %cst_11 = arith.constant 0.00999999977 : f32
    %17 = vector.broadcast %cst_11 : f32 to vector<128x128xf32>
    %18 = arith.mulf %16, %17 : vector<128x128xf32>
    %19 = arith.maximumf %16, %18 : vector<128x128xf32>
    %20 = arith.truncf %19 : vector<128x128xf32> to vector<128x128xbf16>
    %c1_12 = arith.constant 1 : index
    %c0_13 = arith.constant 0 : index
    %c0_14 = arith.constant 0 : index
    %21 = vector.load %arg3[%c1_12, %c0_13, %c0_14] : memref<2x128x128xbf16, #tpu.memory_space<vmem>>, vector<1x128x128xbf16>
    %22 = vector.shape_cast %21 : vector<1x128x128xbf16> to vector<128x128xbf16>
    %c2 = arith.constant 2 : index
    %c0_15 = arith.constant 0 : index
    %23 = vector.load %arg5[%c2, %c0_15] : memref<4x128xf32, #tpu.memory_space<vmem>>, vector<1x128xf32>
    %cst_16 = arith.constant dense<0.000000e+00> : vector<128x128xf32>
    %24 = tpu.matmul %20, %22, %cst_16 {dimension_numbers = #tpu.dot_dimension_numbers<[1], [0], [0], [1], [0, 0, 1, 1], [], []>} : vector<128x128xbf16>, vector<128x128xbf16>, vector<128x128xf32> -> vector<128x128xf32>
    %25 = vector.broadcast %23 : vector<1x128xf32> to vector<128x128xf32>
    %26 = arith.addf %24, %25 : vector<128x128xf32>
    %cst_17 = arith.constant 0.00999999977 : f32
    %27 = vector.broadcast %cst_17 : f32 to vector<128x128xf32>
    %28 = arith.mulf %26, %27 : vector<128x128xf32>
    %29 = arith.maximumf %26, %28 : vector<128x128xf32>
    %30 = arith.truncf %29 : vector<128x128xf32> to vector<128x128xbf16>
    %c0_18 = arith.constant 0 : index
    %c0_19 = arith.constant 0 : index
    %31 = vector.load %arg4[%c0_18, %c0_19] : memref<128x128xbf16, #tpu.memory_space<vmem>>, vector<128x128xbf16>
    %cst_20 = arith.constant dense<0.000000e+00> : vector<128x128xf32>
    %32 = tpu.matmul %30, %31, %cst_20 {dimension_numbers = #tpu.dot_dimension_numbers<[1], [0], [0], [1], [0, 0, 1, 1], [], []>} : vector<128x128xbf16>, vector<128x128xbf16>, vector<128x128xf32> -> vector<128x128xf32>
    %c3 = arith.constant 3 : index
    %c0_21 = arith.constant 0 : index
    %33 = vector.load %arg5[%c3, %c0_21] : memref<4x128xf32, #tpu.memory_space<vmem>>, vector<1x128xf32>
    %34 = vector.broadcast %33 : vector<1x128xf32> to vector<128x128xf32>
    %35 = arith.addf %32, %34 : vector<128x128xf32>
    %36 = vector.extract_strided_slice %35 {offsets = [0, 4], sizes = [128, 1], strides = [1, 1]} : vector<128x128xf32> to vector<128x1xf32>
    %cst_22 = arith.constant dense<0.000000e+00> : vector<128xf32>
    %37 = vector.multi_reduction <add>, %35, %cst_22 [1] : vector<128x128xf32> to vector<128xf32>
    %38 = vector.shape_cast %37 : vector<128xf32> to vector<128x1xf32>
    %39 = arith.subf %38, %36 : vector<128x1xf32>
    %40 = vector.shape_cast %39 : vector<128x1xf32> to vector<1x128x1xf32>
    %cst_23 = arith.constant dense<0.000000e+00> : vector<1xf32>
    %41 = vector.multi_reduction <add>, %40, %cst_23 [1, 2] : vector<1x128x1xf32> to vector<1xf32>
    %42 = vector.shape_cast %41 : vector<1xf32> to vector<1x1x1xf32>
    %43 = vector.extract %42[0, 0, 0] : f32 from vector<1x1x1xf32>
    %44 = vector.broadcast %43 : f32 to vector<1x1xf32>
    %45 = vector.broadcast %36 : vector<128x1xf32> to vector<128x128xf32>
    %46 = arith.addf %45, %35 : vector<128x128xf32>
    %cst_24 = arith.constant 0.001953125 : f32
    %47 = vector.broadcast %cst_24 : f32 to vector<1x1xf32>
    %48 = arith.mulf %44, %47 : vector<1x1xf32>
    %49 = vector.broadcast %48 : vector<1x1xf32> to vector<128x128xf32>
    %50 = arith.subf %46, %49 : vector<128x128xf32>
    %51 = tpu.iota {dimensions = array<i32: 1>} : vector<128x128xi32>
    %c4_i32 = arith.constant 4 : i32
    %52 = vector.broadcast %c4_i32 : i32 to vector<128x128xi32>
    %53 = arith.cmpi slt, %51, %52 : vector<128x128xi32>
    %cst_25 = arith.constant 0.000000e+00 : f32
    %54 = vector.broadcast %cst_25 : f32 to vector<128x128xf32>
    %55 = arith.select %53, %50, %54 : vector<128x128xi1>, vector<128x128xf32>
    %c0_26 = arith.constant 0 : index
    %c0_27 = arith.constant 0 : index
    %56 = vector.load %arg6[%c0_26, %c0_27] : memref<128x128xf32, #tpu.memory_space<vmem>>, vector<128x128xf32>
    tpu.vector_store %arg6[%c0_26, %c0_27], %55 {strides = array<i32>} : memref<128x128xf32, #tpu.memory_space<vmem>>, vector<128x128xf32>,
    %57 = vector.shape_cast %44 : vector<1x1xf32> to vector<1x1xf32>
    %58 = vector.broadcast %57 : vector<1x1xf32> to vector<8x128xf32>
    %c0_28 = arith.constant 0 : index
    %c0_29 = arith.constant 0 : index
    %59 = vector.load %arg7[%c0_28, %c0_29] : memref<8x128xf32, #tpu.memory_space<vmem>>, vector<8x128xf32>
    tpu.vector_store %arg7[%c0_28, %c0_29], %58 {strides = array<i32>} : memref<8x128xf32, #tpu.memory_space<vmem>>, vector<8x128xf32>,
    return
  }
  func.func @transform_0(%arg0: i32) -> (i32, i32) {
    %c0_i32 = arith.constant 0 : i32
    %c0_i32_0 = arith.constant 0 : i32
    return %arg0, %c0_i32 : i32, i32
  }
  func.func @transform_1(%arg0: i32) -> (i32, i32) {
    %c0_i32 = arith.constant 0 : i32
    %c0_i32_0 = arith.constant 0 : i32
    %c0_i32_1 = arith.constant 0 : i32
    return %c0_i32, %c0_i32_0 : i32, i32
  }
  func.func @transform_2(%arg0: i32) -> (i32, i32, i32) {
    %c0_i32 = arith.constant 0 : i32
    %c0_i32_0 = arith.constant 0 : i32
    %c0_i32_1 = arith.constant 0 : i32
    %c0_i32_2 = arith.constant 0 : i32
    return %c0_i32, %c0_i32_0, %c0_i32_1 : i32, i32, i32
  }
  func.func @transform_3(%arg0: i32) -> (i32, i32) {
    %c0_i32 = arith.constant 0 : i32
    %c0_i32_0 = arith.constant 0 : i32
    %c0_i32_1 = arith.constant 0 : i32
    return %c0_i32, %c0_i32_0 : i32, i32
  }
  func.func @transform_4(%arg0: i32) -> (i32, i32) {
    %c0_i32 = arith.constant 0 : i32
    %c0_i32_0 = arith.constant 0 : i32
    %c0_i32_1 = arith.constant 0 : i32
    return %c0_i32, %c0_i32_0 : i32, i32
  }
  func.func @transform_5(%arg0: i32) -> (i32, i32) {
    %c0_i32 = arith.constant 0 : i32
    %c0_i32_0 = arith.constant 0 : i32
    return %arg0, %c0_i32 : i32, i32
  }
  func.func @transform_6(%arg0: i32) -> (i32, i32) {
    %c0_i32 = arith.constant 0 : i32
    %c0_i32_0 = arith.constant 0 : i32
    return %arg0, %c0_i32 : i32, i32
  }
}

</mosaic_0001>

<bundles_post_ra>
// kernel: tpu_custom_call.1
= control target key start
LH: loop header
LB: loop body
LE: loop exit
PB: predicated region body
PF: predicated region fallthrough
CT: control target
= control target key end

     0   :  { %12 = vsyncpa [#allocation3], 0  ;;  %s1942_s0 = inlined_call_operand.vmem [shape: f32[128,16], index: 0, kind: input, shape index: {}]   ;;  %s1943_s1 = inlined_call_operand.vmem [shape: bf16[16,128], index: 1, kind: input, shape index: {}]   ;;  %s1944_s2 = inlined_call_operand.vmem [shape: bf16[2,128,128], index: 2, kind: input, shape index: {}]   ;;  %s1945_s3 = inlined_call_operand.hbm [shape: bf16[128,128], index: 3, kind: input, shape index: {}]   ;;  %s1946_s4 = inlined_call_operand.vmem [shape: f32[4,128], index: 4, kind: input, shape index: {}]   ;;  %s1947_s5 = inlined_call_operand.hbm [shape: f32[128,128], index: 5, kind: output, shape index: {0}]   ;;  %s1948_s6 = inlined_call_operand.hbm [shape: f32[8,128], index: 6, kind: output, shape index: {1}]  }
   0x1   :  { %13 = vsyncpa [#allocation4], 0 }
   0x2   :  { %14 = vsyncpa [#allocation7], 0  ;;  %s1501_s21 = smov [#allocation2]   ;;  %s1429_s25 = scalar_lea.hbm %s1945_s3, 1024 }
   0x3   :  { %s26_s22 = sshll.u32 %s1501_s21, 4  ;;  %p1430_p0 = scmp.ne.s32.totalorder %s1945_s3, %s1429_s25  ;;  %s27_s22 = int_to_ptr.vmem [resolvable:$true] %s26_s22 }
   0x4   :  { %p1433_p1 = scmp.lt.u32.totalorder %s1429_s25, %s1945_s3 }
   0x6   :  { %p1435_p2 = pnand %p1433_p1, %p1430_p0 }
   0x8   :  { %1438 = shalt.err (!%p1435_p2)
}
   0x9   :  { %s1439_s30 = scalar_lea.vmem %s27_s22, 1024  ;;  %p1444_p4 = scmp.lt.s32.totalorder %s27_s22, %s27_s22 }
   0xa   :  { %p1440_p3 = scmp.ne.s32.totalorder %s27_s22, %s1439_s30  ;;  %p1445_p5 = scmp.lt.s32.totalorder %s1439_s30, %s1439_s30 }
   0xc   :  { %p1446_p6 = por %p1445_p5, %p1444_p4 }
   0xe   :  { %p1447_p7 = pnand %p1446_p6, %p1440_p3 }
  0x10   :  { %1450 = shalt.err (!%p1447_p7)
}
  0x11   :  { %s1502_s7 = smov 64   ;;  %s1503_s8 = smov 4  }
  0x12   :  { %32 = dma.hbm_to_vmem [thread:$0]  %s1945_s3, 1024, %s27_s22, [#allocation3], %s1502_s7, %s1502_s7, %s1503_s8  }
  0x13   :  { %1495 = dma.done.wait [#allocation3], 1024  }
  0x14   :  { %1496 = vsyncadd [#allocation3], 4294966272  ;;  %v1404_v0 = vld [vmem:[%s1943_s1] sm:$0xff]   ;;  %v40_v2 = vld [vmem:[%s1942_s0 + $0x8] sm:$0xff]  ;;  %vm76_vm0 = vcmask 130048   ;;  %vm929_vm1 = vcmask 7168  }
  0x15   :  { %v39_v1 = vld [vmem:[%s1942_s0] sm:$0xff]  ;;  %v41_v3 = vld [vmem:[%s1942_s0 + $0x10] sm:$0xff]  ;;  %1261 = vmatprep.subr.bf16.mxu0 %v1404_v0  ;;  %v42_v5 = vld [vmem:[%s1942_s0 + $0x18] sm:$0xff]  ;;  %s1506_s29 = smov [#allocation6]  }
  0x16   :  { %v55_v4 = vpack.c.bf16 %v40_v2, %v39_v1  ;;  %v43_v6 = vld [vmem:[%s1942_s0 + $0x20] sm:$0xff]  ;;  %v44_v7 = vld [vmem:[%s1942_s0 + $0x28] sm:$0xff]  ;;  %1262 = vmatpush3.bf16.msra.mxu0 %v1404_v0  ;;  %v56_v8 = vpack.c.bf16 %v42_v5, %v41_v3  ;;  %v45_v10 = vld [vmem:[%s1942_s0 + $0x30] sm:$0xff]  ;;  %s1138_s30 = sshll.u32 %s1506_s29, 4  ;;  %s1139_s30 = int_to_ptr.vmem [resolvable:$true] %s1138_s30 }
  0x17   :  { %v57_v9 = vpack.c.bf16 %v44_v7, %v43_v6  ;;  %v46_v11 = vld [vmem:[%s1942_s0 + $0x38] sm:$0xff]  ;;  %v47_v12 = vld [vmem:[%s1942_s0 + $0x40] sm:$0xff]  ;;  %v48_v13 = vld [vmem:[%s1942_s0 + $0x48] sm:$0xff]  ;;  %s1451_s7 = scalar_lea.vmem %s1139_s30, 128  ;;  %p1456_p9 = scmp.lt.s32.totalorder %s1139_s30, %s1139_s30 }
  0x18   :  { %1263 = vmatprep.mubr.msk.bf16.mxu0 %vm76_vm0, %v55_v4  ;;  %v1405_v14 = vld [vmem:[%s1944_s2] sm:$0xff]   ;;  %v1406_v15 = vld [vmem:[%s1944_s2 + $0x8] sm:$0xff]   ;;  %v58_v16 = vpack.c.bf16 %v46_v11, %v45_v10  ;;  %v59_v17 = vpack.c.bf16 %v48_v13, %v47_v12  ;;  %v1407_v18 = vld [vmem:[%s1944_s2 + $0x10] sm:$0xff]   ;;  %p1452_p8 = scmp.ne.s32.totalorder %s1139_s30, %s1451_s7  ;;  %p1457_p10 = scmp.lt.s32.totalorder %s1451_s7, %s1451_s7 }
  0x19   :  { %1264 = vmatmul.mubr.msk.bf16.vlgmr.msra.gmra.mrb[0].mxu0 %vm76_vm0, %v56_v8  ;;  %1279 = vmatprep.subr.bf16.mxu1 %v1405_v14  ;;  %v49_v19 = vld [vmem:[%s1942_s0 + $0x50] sm:$0xff]  ;;  %v50_v20 = vld [vmem:[%s1942_s0 + $0x58] sm:$0xff]  ;;  %v51_v22 = vld [vmem:[%s1942_s0 + $0x60] sm:$0xff] }
  0x1a   :  { %1267 = vmatprep.mubr.msk.bf16.mxu0 %vm76_vm0, %v57_v9  ;;  %1280 = vmatpush3.bf16.msra.mxu1 %v1405_v14  ;;  %v1408_v21 = vld [vmem:[%s1944_s2 + $0x18] sm:$0xff]   ;;  %v52_v23 = vld [vmem:[%s1942_s0 + $0x68] sm:$0xff]  ;;  %v1409_v24 = vld [vmem:[%s1944_s2 + $0x20] sm:$0xff]   ;;  %v60_v25 = vpack.c.bf16 %v50_v20, %v49_v19  ;;  %p1458_p11 = por %p1457_p10, %p1456_p9 }
  0x1b   :  { %1281 = vmatprep.subr.bf16.mxu1 %v1406_v15  ;;  %v61_v26 = vpack.c.bf16 %v52_v23, %v51_v22  ;;  %v53_v27 = vld [vmem:[%s1942_s0 + $0x70] sm:$0xff]  ;;  %v54_v28 = vld [vmem:[%s1942_s0 + $0x78] sm:$0xff]  ;;  %v1410_v30 = vld [vmem:[%s1944_s2 + $0x28] sm:$0xff]  }
  0x1c   :  { %v62_v29 = vpack.c.bf16 %v54_v28, %v53_v27  ;;  %v1411_v31 = vld [vmem:[%s1944_s2 + $0x30] sm:$0xff]   ;;  %v1412_v32 = vld [vmem:[%s1944_s2 + $0x38] sm:$0xff]   ;;  %v1413_v33 = vld [vmem:[%s1944_s2 + $0x40] sm:$0xff]   ;;  %p1459_p12 = pnand %p1458_p11, %p1452_p8 }
  0x1d   :  { %v1414_v34 = vld [vmem:[%s1944_s2 + $0x48] sm:$0xff]   ;;  %1311 = vmatprep.subr.bf16.mxu0 %v1413_v33  ;;  %v1415_v35 = vld [vmem:[%s1944_s2 + $0x50] sm:$0xff]   ;;  %v1416_v36 = vld [vmem:[%s1944_s2 + $0x58] sm:$0xff]  }
  0x1e   :  { %1282 = vmatpush3.bf16.msra.mxu1 %v1406_v15  ;;  %1312 = vmatpush3.bf16.msra.mxu0 %v1413_v33  ;;  %v1417_v37 = vld [vmem:[%s1944_s2 + $0x60] sm:$0xff]  }
  0x1f   :  { %1283 = vmatprep.subr.bf16.mxu1 %v1407_v18  ;;  %1313 = vmatprep.subr.bf16.mxu0 %v1414_v34  ;;  %v1658_v38 = vld [vmem:[%s1946_s4] ss:$0 sm:$0xff] }
  0x21   :  { %1268 = vmatmul.mubr.msk.bf16.gmra.mrb[4].mxu0 %vm76_vm0, %v58_v16 }
  0x22   :  { %1271 = vmatprep.mubr.msk.bf16.mxu0 %vm76_vm0, %v59_v17  ;;  %1284 = vmatpush3.bf16.msra.mxu1 %v1407_v18 }
  0x23   :  { %1285 = vmatprep.subr.bf16.mxu1 %v1408_v21  ;;  %1314 = vmatpush3.bf16.msra.mxu0 %v1414_v34 }
  0x24   :  { %1315 = vmatprep.subr.bf16.mxu0 %v1415_v35 }
  0x26   :  { %1286 = vmatpush3.bf16.msra.mxu1 %v1408_v21 }
  0x27   :  { %1287 = vmatprep.subr.bf16.mxu1 %v1409_v24  ;;  %1316 = vmatpush3.bf16.msra.mxu0 %v1415_v35 }
  0x28   :  { %1317 = vmatprep.subr.bf16.mxu0 %v1416_v36 }
  0x29   :  { %1272 = vmatmul.mubr.msk.bf16.gmra.mrb[8].mxu0 %vm76_vm0, %v60_v25 }
  0x2a   :  { %1275 = vmatprep.mubr.msk.bf16.mxu0 %vm76_vm0, %v61_v26  ;;  %1288 = vmatpush3.bf16.msra.mxu1 %v1409_v24 }
  0x2b   :  { %1289 = vmatprep.subr.bf16.mxu1 %v1410_v30  ;;  %1318 = vmatpush3.bf16.msra.mxu0 %v1416_v36 }
  0x2c   :  { %1319 = vmatprep.subr.bf16.mxu0 %v1417_v37 }
  0x2e   :  { %1290 = vmatpush3.bf16.msra.mxu1 %v1410_v30 }
  0x2f   :  { %1291 = vmatprep.subr.bf16.mxu1 %v1411_v31  ;;  %1320 = vmatpush3.bf16.msra.mxu0 %v1417_v37 }
  0x31   :  { %1276 = vmatmul.mubr.msk.bf16.gmra.mrb[12].mxu0 %vm76_vm0, %v62_v29 }
  0x32   :  { %1292 = vmatpush3.bf16.msra.mxu1 %v1411_v31 }
  0x33   :  { %1293 = vmatprep.subr.bf16.mxu1 %v1412_v32 }
  0x36   :  { %1294 = vmatpush3.bf16.msra.mxu1 %v1412_v32 }
  0xec   :  { %v1265_v39 = vpop.f32.mrb[0].mxu0 }
  0xed   :  { %v144_v40 = vadd.f32 %v1265_v39, %v1658_v38  ;;  %v135_v41 = vpop.f32.mrb[1].mxu0 }
  0xee   :  { %v136_v42 = vadd.f32 %v1658_v38, %v135_v41  ;;  %v1266_v43 = vpop.f32.mrb[2].mxu0 }
  0xef   :  { %v200_v44 = vmul.f32 0.01, %v144_v40  ;;  %v147_v45 = vadd.f32 %v1266_v43, %v1658_v38  ;;  %v138_v46 = vpop.f32.mrb[3].mxu0 }
  0xf0   :  { %v198_v47 = vmul.f32 0.01, %v136_v42  ;;  %v139_v48 = vadd.f32 %v1658_v38, %v138_v46 }
  0xf1   :  { %v201_v49 = vmul.f32 0.01, %v147_v45  ;;  %v216_v51 = vmax.f32 %v144_v40, %v200_v44 }
  0xf2   :  { %v199_v50 = vmul.f32 0.01, %v139_v48  ;;  %v214_v54 = vmax.f32 %v136_v42, %v198_v47 }
  0xf3   :  { %v217_v52 = vmax.f32 %v147_v45, %v201_v49  ;;  %v1420_v49 = vld [vmem:[%s1944_s2 + $0x78] sm:$0xff]  }
  0xf4   :  { %v1269_v53 = vpop.f32.mrb[4].mxu0  ;;  %v215_v55 = vmax.f32 %v139_v48, %v199_v50  ;;  %v1418_v48 = vld [vmem:[%s1944_s2 + $0x68] sm:$0xff]   ;;  %v1421_v50 = vld [vmem:[#allocation2] sm:$0xff]  }
  0xf5   :  { %v160_v56 = vadd.f32 %v1269_v53, %v1658_v38  ;;  %v151_v57 = vpop.f32.mrb[5].mxu0  ;;  %v231_v58 = vpack.c.bf16 %v217_v52, %v216_v51  ;;  %1321 = vmatprep.subr.bf16.mxu0 %v1418_v48  ;;  %v1422_v51 = vld [vmem:[#allocation2 + $0x8] sm:$0xff]   ;;  %1375 = vmatprep.subr.bf16.mxu1 %v1421_v50  ;;  %v1685_v52 = vld [vmem:[#allocation2 + $0x10] sm:$0xff]   ;;  %v1688_v53 = vld [vmem:[#allocation2 + $0x18] sm:$0xff]  }
  0xf6   :  { %v152_v59 = vadd.f32 %v1658_v38, %v151_v57  ;;  %v1270_v60 = vpop.f32.mrb[6].mxu0  ;;  %v230_v61 = vpack.c.bf16 %v215_v55, %v214_v54  ;;  %1322 = vmatpush3.bf16.msra.mxu0 %v1418_v48  ;;  %v1692_v54 = vld [vmem:[#allocation2 + $0x20] sm:$0xff]  }
  0xf7   :  { %v204_v62 = vmul.f32 0.01, %v160_v56  ;;  %v163_v63 = vadd.f32 %v1270_v60, %v1658_v38  ;;  %v154_v0 = vpop.f32.mrb[7].mxu0  ;;  %v1700_v55 = vld [vmem:[%s1946_s4 + $0x1] ss:$0 sm:$0xff] }
  0xf8   :  { %v202_v1 = vmul.f32 0.01, %v152_v59  ;;  %v155_v2 = vadd.f32 %v1658_v38, %v154_v0  ;;  %1295 = vmatprep.mubr.bf16.mxu1 %v230_v61 }
  0xf9   :  { %v205_v3 = vmul.f32 0.01, %v163_v63  ;;  %1296 = vmatmul.mubr.bf16.vlgmr.msra.gmra.mrb[0].mxu1 %v231_v58  ;;  %v220_v5 = vmax.f32 %v160_v56, %v204_v62 }
  0xfa   :  { %v203_v4 = vmul.f32 0.01, %v155_v2  ;;  %v218_v7 = vmax.f32 %v152_v59, %v202_v1  ;;  %1383 = vmatpush3.bf16.msra.mxu1 %v1421_v50 }
  0xfb   :  { %v221_v6 = vmax.f32 %v163_v63, %v205_v3  ;;  %1376 = vmatprep.subr.bf16.mxu1 %v1422_v51 }
  0xfc   :  { %v219_v8 = vmax.f32 %v155_v2, %v203_v4  ;;  %v1273_v9 = vpop.f32.mrb[8].mxu0 }
  0xfd   :  { %v176_v10 = vadd.f32 %v1273_v9, %v1658_v38  ;;  %v167_v11 = vpop.f32.mrb[9].mxu0  ;;  %v233_v12 = vpack.c.bf16 %v221_v6, %v220_v5 }
  0xfe   :  { %v168_v13 = vadd.f32 %v1658_v38, %v167_v11  ;;  %v1274_v14 = vpop.f32.mrb[10].mxu0  ;;  %v232_v15 = vpack.c.bf16 %v219_v8, %v218_v7  ;;  %1384 = vmatpush3.bf16.msra.mxu1 %v1422_v51 }
  0xff   :  { %v208_v16 = vmul.f32 0.01, %v176_v10  ;;  %v179_v17 = vadd.f32 %v1274_v14, %v1658_v38  ;;  %v170_v18 = vpop.f32.mrb[11].mxu0  ;;  %1377 = vmatprep.subr.bf16.mxu1 %v1685_v52 }
 0x100   :  { %v206_v19 = vmul.f32 0.01, %v168_v13  ;;  %v171_v20 = vadd.f32 %v1658_v38, %v170_v18  ;;  %1299 = vmatprep.mubr.bf16.mxu1 %v232_v15 }
 0x101   :  { %v209_v21 = vmul.f32 0.01, %v179_v17  ;;  %1300 = vmatmul.mubr.bf16.gmra.mrb[4].mxu1 %v233_v12  ;;  %v224_v23 = vmax.f32 %v176_v10, %v208_v16 }
 0x102   :  { %v207_v22 = vmul.f32 0.01, %v171_v20  ;;  %v222_v25 = vmax.f32 %v168_v13, %v206_v19  ;;  %1385 = vmatpush3.bf16.msra.mxu1 %v1685_v52 }
 0x103   :  { %v225_v24 = vmax.f32 %v179_v17, %v209_v21  ;;  %1378 = vmatprep.subr.bf16.mxu1 %v1688_v53 }
 0x104   :  { %v223_v26 = vmax.f32 %v171_v20, %v207_v22  ;;  %v1277_v27 = vpop.f32.mrb[12].mxu0 }
 0x105   :  { %v192_v28 = vadd.f32 %v1277_v27, %v1658_v38  ;;  %v183_v29 = vpop.f32.mrb[13].mxu0  ;;  %v235_v30 = vpack.c.bf16 %v225_v24, %v224_v23 }
 0x106   :  { %v184_v31 = vadd.f32 %v1658_v38, %v183_v29  ;;  %v1278_v32 = vpop.f32.mrb[14].mxu0  ;;  %v234_v33 = vpack.c.bf16 %v223_v26, %v222_v25  ;;  %1386 = vmatpush3.bf16.msra.mxu1 %v1688_v53 }
 0x107   :  { %v212_v34 = vmul.f32 0.01, %v192_v28  ;;  %v195_v35 = vadd.f32 %v1278_v32, %v1658_v38  ;;  %v186_v36 = vpop.f32.mrb[15].mxu0  ;;  %1379 = vmatprep.subr.bf16.mxu1 %v1692_v54 }
 0x108   :  { %v210_v37 = vmul.f32 0.01, %v184_v31  ;;  %v187_v39 = vadd.f32 %v1658_v38, %v186_v36  ;;  %1303 = vmatprep.mubr.bf16.mxu1 %v234_v33  ;;  %v1419_v38 = vld [vmem:[%s1944_s2 + $0x70] sm:$0xff]  }
 0x109   :  { %v213_v40 = vmul.f32 0.01, %v195_v35  ;;  %1304 = vmatmul.mubr.bf16.gmra.mrb[8].mxu1 %v235_v30  ;;  %v228_v42 = vmax.f32 %v192_v28, %v212_v34  ;;  %1323 = vmatprep.subr.bf16.mxu0 %v1419_v38 }
 0x10a   :  { %v211_v41 = vmul.f32 0.01, %v187_v39  ;;  %v226_v44 = vmax.f32 %v184_v31, %v210_v37  ;;  %1324 = vmatpush3.bf16.msra.mxu0 %v1419_v38  ;;  %1387 = vmatpush3.bf16.msra.mxu1 %v1692_v54 }
 0x10b   :  { %v229_v43 = vmax.f32 %v195_v35, %v213_v40  ;;  %1325 = vmatprep.subr.bf16.mxu0 %v1420_v49 }
 0x10c   :  { %v227_v45 = vmax.f32 %v187_v39, %v211_v41 }
 0x10d   :  { %v237_v46 = vpack.c.bf16 %v229_v43, %v228_v42 }
 0x10e   :  { %v236_v47 = vpack.c.bf16 %v227_v45, %v226_v44  ;;  %1326 = vmatpush3.bf16.msra.mxu0 %v1420_v49 }
 0x10f   :  { %1343 = vmatprep.subr.bf16.mxu0 %v1421_v50 }
 0x110   :  { %1307 = vmatprep.mubr.bf16.mxu1 %v236_v47 }
 0x111   :  { %1308 = vmatmul.mubr.bf16.gmra.mrb[12].mxu1 %v237_v46 }
 0x1cc   :  { %v1297_v56 = vpop.f32.mrb[0].mxu1 }
 0x1cd   :  { %v350_v57 = vadd.f32 %v1297_v56, %v1700_v55  ;;  %v341_v58 = vpop.f32.mrb[1].mxu1 }
 0x1ce   :  { %v342_v59 = vadd.f32 %v1700_v55, %v341_v58  ;;  %v1298_v60 = vpop.f32.mrb[2].mxu1 }
 0x1cf   :  { %v406_v61 = vmul.f32 0.01, %v350_v57  ;;  %v353_v62 = vadd.f32 %v1298_v60, %v1700_v55  ;;  %v344_v63 = vpop.f32.mrb[3].mxu1 }
 0x1d0   :  { %v404_v0 = vmul.f32 0.01, %v342_v59  ;;  %v345_v1 = vadd.f32 %v1700_v55, %v344_v63 }
 0x1d1   :  { %v407_v2 = vmul.f32 0.01, %v353_v62  ;;  %v422_v4 = vmax.f32 %v350_v57, %v406_v61 }
 0x1d2   :  { %v405_v3 = vmul.f32 0.01, %v345_v1  ;;  %v420_v6 = vmax.f32 %v342_v59, %v404_v0 }
 0x1d3   :  { %v423_v5 = vmax.f32 %v353_v62, %v407_v2  ;;  %v1426_v2 = vld [vmem:[#allocation2 + $0x28] sm:$0xff]  }
 0x1d4   :  { %v421_v7 = vmax.f32 %v345_v1, %v405_v3  ;;  %v1301_v8 = vpop.f32.mrb[4].mxu1  ;;  %1380 = vmatprep.subr.bf16.mxu1 %v1426_v2  ;;  %v1428_v3 = vld [vmem:[#allocation2 + $0x38] sm:$0xff]  }
 0x1d5   :  { %v437_v9 = vpack.c.bf16 %v423_v5, %v422_v4  ;;  %v366_v10 = vadd.f32 %v1301_v8, %v1700_v55  ;;  %v357_v11 = vpop.f32.mrb[5].mxu1  ;;  %1388 = vmatpush3.bf16.msra.mxu1 %v1426_v2 }
 0x1d6   :  { %v358_v12 = vadd.f32 %v1700_v55, %v357_v11  ;;  %v1302_v13 = vpop.f32.mrb[6].mxu1  ;;  %v436_v14 = vpack.c.bf16 %v421_v7, %v420_v6 }
 0x1d7   :  { %v410_v15 = vmul.f32 0.01, %v366_v10  ;;  %v369_v16 = vadd.f32 %v1302_v13, %v1700_v55  ;;  %v360_v17 = vpop.f32.mrb[7].mxu1 }
 0x1d8   :  { %v408_v18 = vmul.f32 0.01, %v358_v12  ;;  %v361_v19 = vadd.f32 %v1700_v55, %v360_v17  ;;  %1327 = vmatprep.mubr.bf16.mxu0 %v436_v14 }
 0x1d9   :  { %v411_v20 = vmul.f32 0.01, %v369_v16  ;;  %1328 = vmatmul.mubr.bf16.vlgmr.msra.gmra.mrb[16].mxu0 %v437_v9  ;;  %v426_v22 = vmax.f32 %v366_v10, %v410_v15 }
 0x1da   :  { %v409_v21 = vmul.f32 0.01, %v361_v19  ;;  %1344 = vmatpush3.bf16.msra.mxu0 %v1421_v50  ;;  %v424_v24 = vmax.f32 %v358_v12, %v408_v18 }
 0x1db   :  { %v427_v23 = vmax.f32 %v369_v16, %v411_v20  ;;  %1345 = vmatprep.subr.bf16.mxu0 %v1422_v51 }
 0x1dc   :  { %v425_v25 = vmax.f32 %v361_v19, %v409_v21  ;;  %v1305_v26 = vpop.f32.mrb[8].mxu1 }
 0x1dd   :  { %v382_v27 = vadd.f32 %v1305_v26, %v1700_v55  ;;  %v373_v28 = vpop.f32.mrb[9].mxu1  ;;  %v439_v29 = vpack.c.bf16 %v427_v23, %v426_v22 }
 0x1de   :  { %v374_v30 = vadd.f32 %v1700_v55, %v373_v28  ;;  %v1306_v31 = vpop.f32.mrb[10].mxu1  ;;  %v438_v32 = vpack.c.bf16 %v425_v25, %v424_v24  ;;  %1346 = vmatpush3.bf16.msra.mxu0 %v1422_v51 }
 0x1df   :  { %v414_v33 = vmul.f32 0.01, %v382_v27  ;;  %v385_v34 = vadd.f32 %v1306_v31, %v1700_v55  ;;  %v376_v35 = vpop.f32.mrb[11].mxu1  ;;  %1347 = vmatprep.subr.bf16.mxu0 %v1685_v52 }
 0x1e0   :  { %v412_v36 = vmul.f32 0.01, %v374_v30  ;;  %v377_v37 = vadd.f32 %v1700_v55, %v376_v35  ;;  %1331 = vmatprep.mubr.bf16.mxu0 %v438_v32 }
 0x1e1   :  { %v415_v39 = vmul.f32 0.01, %v385_v34  ;;  %1332 = vmatmul.mubr.bf16.gmra.mrb[20].mxu0 %v439_v29  ;;  %v430_v41 = vmax.f32 %v382_v27, %v414_v33 }
 0x1e2   :  { %v413_v40 = vmul.f32 0.01, %v377_v37  ;;  %1348 = vmatpush3.bf16.msra.mxu0 %v1685_v52  ;;  %v428_v43 = vmax.f32 %v374_v30, %v412_v36 }
 0x1e3   :  { %v431_v42 = vmax.f32 %v385_v34, %v415_v39  ;;  %1349 = vmatprep.subr.bf16.mxu0 %v1688_v53 }
 0x1e4   :  { %v429_v44 = vmax.f32 %v377_v37, %v413_v40  ;;  %v1309_v45 = vpop.f32.mrb[12].mxu1 }
 0x1e5   :  { %v398_v46 = vadd.f32 %v1309_v45, %v1700_v55  ;;  %v389_v47 = vpop.f32.mrb[13].mxu1  ;;  %v441_v48 = vpack.c.bf16 %v431_v42, %v430_v41 }
 0x1e6   :  { %v390_v38 = vadd.f32 %v1700_v55, %v389_v47  ;;  %v1310_v49 = vpop.f32.mrb[14].mxu1  ;;  %v440_v50 = vpack.c.bf16 %v429_v44, %v428_v43  ;;  %1350 = vmatpush3.bf16.msra.mxu0 %v1688_v53 }
 0x1e7   :  { %v418_v51 = vmul.f32 0.01, %v398_v46  ;;  %v401_v52 = vadd.f32 %v1310_v49, %v1700_v55  ;;  %v392_v56 = vpop.f32.mrb[15].mxu1  ;;  %1351 = vmatprep.subr.bf16.mxu0 %v1692_v54 }
 0x1e8   :  { %v416_v57 = vmul.f32 0.01, %v390_v38  ;;  %v393_v58 = vadd.f32 %v1700_v55, %v392_v56  ;;  %1335 = vmatprep.mubr.bf16.mxu0 %v440_v50  ;;  %v1427_v55 = vld [vmem:[#allocation2 + $0x30] sm:$0xff]  }
 0x1e9   :  { %v419_v59 = vmul.f32 0.01, %v401_v52  ;;  %1336 = vmatmul.mubr.bf16.gmra.mrb[24].mxu0 %v441_v48  ;;  %v434_v61 = vmax.f32 %v398_v46, %v418_v51  ;;  %1381 = vmatprep.subr.bf16.mxu1 %v1427_v55 }
 0x1ea   :  { %v417_v60 = vmul.f32 0.01, %v393_v58  ;;  %1352 = vmatpush3.bf16.msra.mxu0 %v1692_v54  ;;  %v432_v63 = vmax.f32 %v390_v38, %v416_v57  ;;  %1389 = vmatpush3.bf16.msra.mxu1 %v1427_v55  ;;  %v1727_v54 = vld [vmem:[%s1946_s4 + $0x2] ss:$0 sm:$0xff] }
 0x1eb   :  { %v435_v62 = vmax.f32 %v401_v52, %v419_v59  ;;  %1353 = vmatprep.subr.bf16.mxu0 %v1426_v2  ;;  %1382 = vmatprep.subr.bf16.mxu1 %v1428_v3 }
 0x1ec   :  { %v433_v0 = vmax.f32 %v393_v58, %v417_v60 }
 0x1ed   :  { %v443_v53 = vpack.c.bf16 %v435_v62, %v434_v61 }
 0x1ee   :  { %v442_v1 = vpack.c.bf16 %v433_v0, %v432_v63  ;;  %1354 = vmatpush3.bf16.msra.mxu0 %v1426_v2  ;;  %1390 = vmatpush3.bf16.msra.mxu1 %v1428_v3 }
 0x1ef   :  { %1355 = vmatprep.subr.bf16.mxu0 %v1427_v55 }
 0x1f0   :  { %1339 = vmatprep.mubr.bf16.mxu0 %v442_v1 }
 0x1f1   :  { %1340 = vmatmul.mubr.bf16.gmra.mrb[28].mxu0 %v443_v53 }
 0x1f2   :  { %1356 = vmatpush3.bf16.msra.mxu0 %v1427_v55 }
 0x1f3   :  { %1357 = vmatprep.subr.bf16.mxu0 %v1428_v3 }
 0x1f6   :  { %1358 = vmatpush3.bf16.msra.mxu0 %v1428_v3 }
 0x2ac   :  { %v1329_v4 = vpop.f32.mrb[16].mxu0 }
 0x2ad   :  { %v557_v5 = vadd.f32 %v1329_v4, %v1727_v54  ;;  %v548_v6 = vpop.f32.mrb[17].mxu0 }
 0x2ae   :  { %v549_v7 = vadd.f32 %v1727_v54, %v548_v6  ;;  %v1330_v8 = vpop.f32.mrb[18].mxu0 }
 0x2af   :  { %v613_v9 = vmul.f32 0.01, %v557_v5  ;;  %v560_v10 = vadd.f32 %v1330_v8, %v1727_v54  ;;  %v551_v11 = vpop.f32.mrb[19].mxu0 }
 0x2b0   :  { %v611_v12 = vmul.f32 0.01, %v549_v7  ;;  %v552_v13 = vadd.f32 %v1727_v54, %v551_v11 }
 0x2b1   :  { %v614_v14 = vmul.f32 0.01, %v560_v10  ;;  %v629_v16 = vmax.f32 %v557_v5, %v613_v9 }
 0x2b2   :  { %v612_v15 = vmul.f32 0.01, %v552_v13  ;;  %v627_v18 = vmax.f32 %v549_v7, %v611_v12 }
 0x2b3   :  { %v630_v17 = vmax.f32 %v560_v10, %v614_v14 }
 0x2b4   :  { %v628_v19 = vmax.f32 %v552_v13, %v612_v15  ;;  %v1333_v20 = vpop.f32.mrb[20].mxu0  ;;  %v1195_v13 = vld [vmem:[%s1946_s4 + $0x3] ss:$0 sm:$0xff]  ;;  %s1505_s4 = smov 124  }
 0x2b5   :  { %v644_v21 = vpack.c.bf16 %v630_v17, %v629_v16  ;;  %v573_v22 = vadd.f32 %v1333_v20, %v1727_v54  ;;  %v564_v23 = vpop.f32.mrb[21].mxu0 }
 0x2b6   :  { %v565_v24 = vadd.f32 %v1727_v54, %v564_v23  ;;  %v1334_v25 = vpop.f32.mrb[22].mxu0  ;;  %v643_v26 = vpack.c.bf16 %v628_v19, %v627_v18 }
 0x2b7   :  { %v617_v27 = vmul.f32 0.01, %v573_v22  ;;  %v576_v28 = vadd.f32 %v1334_v25, %v1727_v54  ;;  %v567_v29 = vpop.f32.mrb[23].mxu0 }
 0x2b8   :  { %v615_v30 = vmul.f32 0.01, %v565_v24  ;;  %v568_v31 = vadd.f32 %v1727_v54, %v567_v29  ;;  %1359 = vmatprep.mubr.bf16.mxu0 %v643_v26 }
 0x2b9   :  { %v618_v32 = vmul.f32 0.01, %v576_v28  ;;  %1360 = vmatmul.mubr.bf16.vlgmr.msra.gmra.mrb[32].mxu0 %v644_v21  ;;  %v633_v34 = vmax.f32 %v573_v22, %v617_v27 }
 0x2ba   :  { %v616_v33 = vmul.f32 0.01, %v568_v31  ;;  %v631_v36 = vmax.f32 %v565_v24, %v615_v30 }
 0x2bb   :  { %v634_v35 = vmax.f32 %v576_v28, %v618_v32 }
 0x2bc   :  { %v632_v37 = vmax.f32 %v568_v31, %v616_v33  ;;  %v1337_v39 = vpop.f32.mrb[24].mxu0 }
 0x2bd   :  { %v646_v40 = vpack.c.bf16 %v634_v35, %v633_v34  ;;  %v589_v41 = vadd.f32 %v1337_v39, %v1727_v54  ;;  %v580_v42 = vpop.f32.mrb[25].mxu0 }
 0x2be   :  { %v581_v43 = vadd.f32 %v1727_v54, %v580_v42  ;;  %v1338_v44 = vpop.f32.mrb[26].mxu0  ;;  %v645_v45 = vpack.c.bf16 %v632_v37, %v631_v36 }
 0x2bf   :  { %v621_v46 = vmul.f32 0.01, %v589_v41  ;;  %v592_v47 = vadd.f32 %v1338_v44, %v1727_v54  ;;  %v583_v48 = vpop.f32.mrb[27].mxu0 }
 0x2c0   :  { %v619_v38 = vmul.f32 0.01, %v581_v43  ;;  %v584_v49 = vadd.f32 %v1727_v54, %v583_v48  ;;  %1363 = vmatprep.mubr.bf16.mxu1 %v645_v45 }
 0x2c1   :  { %v622_v50 = vmul.f32 0.01, %v592_v47  ;;  %1364 = vmatmul.mubr.bf16.vlgmr.msra.gmra.mrb[16].mxu1 %v646_v40  ;;  %v637_v52 = vmax.f32 %v589_v41, %v621_v46  ;;  %v1504_v46 = vmov 4  }
 0x2c2   :  { %v620_v51 = vmul.f32 0.01, %v584_v49  ;;  %v635_v57 = vmax.f32 %v581_v43, %v619_v38  ;;  %1402 = vset.pattern.permute.xlu1 %v1504_v46  ;;  %1403 = vset.pattern.permute.xlu0 %v1504_v46 }
 0x2c3   :  { %v638_v56 = vmax.f32 %v592_v47, %v622_v50 }
 0x2c4   :  { %v636_v58 = vmax.f32 %v584_v49, %v620_v51  ;;  %v1341_v59 = vpop.f32.mrb[28].mxu0 }
 0x2c5   :  { %v605_v60 = vadd.f32 %v1341_v59, %v1727_v54  ;;  %v596_v61 = vpop.f32.mrb[29].mxu0  ;;  %v648_v62 = vpack.c.bf16 %v638_v56, %v637_v52 }
 0x2c6   :  { %v597_v63 = vadd.f32 %v1727_v54, %v596_v61  ;;  %v1342_v0 = vpop.f32.mrb[30].mxu0  ;;  %v647_v53 = vpack.c.bf16 %v636_v58, %v635_v57 }
 0x2c7   :  { %v625_v1 = vmul.f32 0.01, %v605_v60  ;;  %v608_v2 = vadd.f32 %v1342_v0, %v1727_v54  ;;  %v599_v55 = vpop.f32.mrb[31].mxu0 }
 0x2c8   :  { %v623_v3 = vmul.f32 0.01, %v597_v63  ;;  %v600_v4 = vadd.f32 %v1727_v54, %v599_v55  ;;  %1367 = vmatprep.mubr.bf16.mxu1 %v647_v53 }
 0x2c9   :  { %v626_v5 = vmul.f32 0.01, %v608_v2  ;;  %1368 = vmatmul.mubr.bf16.gmra.mrb[20].mxu1 %v648_v62  ;;  %v641_v7 = vmax.f32 %v605_v60, %v625_v1 }
 0x2ca   :  { %v624_v6 = vmul.f32 0.01, %v600_v4  ;;  %v639_v9 = vmax.f32 %v597_v63, %v623_v3 }
 0x2cb   :  { %v642_v8 = vmax.f32 %v608_v2, %v626_v5 }
 0x2cc   :  { %v640_v10 = vmax.f32 %v600_v4, %v624_v6 }
 0x2cd   :  { %v650_v11 = vpack.c.bf16 %v642_v8, %v641_v7 }
 0x2ce   :  { %v649_v12 = vpack.c.bf16 %v640_v10, %v639_v9 }
 0x2d0   :  { %1371 = vmatprep.mubr.bf16.mxu1 %v649_v12 }
 0x2d1   :  { %1372 = vmatmul.mubr.bf16.gmra.mrb[24].mxu1 %v650_v11 }
 0x38c   :  { %v1361_v14 = vpop.f32.mrb[32].mxu0 }
 0x38d   :  { %v1748_v15 = vadd.f32 %v1361_v14, %v1195_v13  ;;  %v754_v54 = vpop.f32.mrb[33].mxu0 }
 0x38e   :  { %v1750_v16 = vadd.f32 %v1195_v13, %v754_v54  ;;  %v1362_v17 = vpop.f32.mrb[34].mxu0 }
 0x38f   :  { %821 = vadd.xlane.f32.xlu1 %v1748_v15  ;;  %v757_v18 = vpop.f32.mrb[35].mxu0  ;;  %v1754_v19 = vadd.f32 %v1362_v17, %v1195_v13 }
 0x390   :  { %817 = vadd.xlane.f32.xlu0 %v1750_v16  ;;  %v1756_v20 = vadd.f32 %v1195_v13, %v757_v18 }
 0x393   :  { %823 = vadd.xlane.f32.xlu1 %v1754_v19 }
 0x394   :  { %v1365_v21 = vpop.f32.mrb[16].mxu1  ;;  %819 = vadd.xlane.f32.xlu0 %v1756_v20 }
 0x395   :  { %v770_v22 = vpop.f32.mrb[17].mxu1  ;;  %v1765_v27 = vadd.f32 %v1365_v21, %v1195_v13 }
 0x396   :  { %v1760_v23 = vadd.f32 %v1195_v13, %v770_v22  ;;  %v1366_v24 = vpop.f32.mrb[18].mxu1 }
 0x397   :  { %v773_v25 = vpop.f32.mrb[19].mxu1  ;;  %v1768_v28 = vadd.f32 %v1366_v24, %v1195_v13 }
 0x398   :  { %v1762_v26 = vadd.f32 %v1195_v13, %v773_v25  ;;  %825 = vadd.xlane.f32.xlu0 %v1760_v23 }
 0x39a   :  { %827 = vadd.xlane.f32.xlu1 %v1762_v26 }
 0x39c   :  { %v1369_v29 = vpop.f32.mrb[20].mxu1  ;;  %829 = vadd.xlane.f32.xlu0 %v1765_v27 }
 0x39d   :  { %v786_v30 = vpop.f32.mrb[21].mxu1  ;;  %v1777_v35 = vadd.f32 %v1369_v29, %v1195_v13 }
 0x39e   :  { %v1771_v31 = vadd.f32 %v1195_v13, %v786_v30  ;;  %v1370_v32 = vpop.f32.mrb[22].mxu1  ;;  %831 = vadd.xlane.f32.xlu1 %v1768_v28 }
 0x39f   :  { %v789_v33 = vpop.f32.mrb[23].mxu1  ;;  %v1780_v36 = vadd.f32 %v1370_v32, %v1195_v13 }
 0x3a0   :  { %v1774_v34 = vadd.f32 %v1195_v13, %v789_v33  ;;  %833 = vadd.xlane.f32.xlu0 %v1771_v31 }
 0x3a2   :  { %835 = vadd.xlane.f32.xlu1 %v1774_v34 }
 0x3a4   :  { %v1373_v37 = vpop.f32.mrb[24].mxu1  ;;  %837 = vadd.xlane.f32.xlu0 %v1777_v35 }
 0x3a5   :  { %v802_v39 = vpop.f32.mrb[25].mxu1  ;;  %v1789_v44 = vadd.f32 %v1373_v37, %v1195_v13 }
 0x3a6   :  { %v1783_v40 = vadd.f32 %v1195_v13, %v802_v39  ;;  %v1374_v41 = vpop.f32.mrb[26].mxu1  ;;  %839 = vadd.xlane.f32.xlu1 %v1780_v36 }
 0x3a7   :  { %v805_v42 = vpop.f32.mrb[27].mxu1  ;;  %v1792_v45 = vadd.f32 %v1374_v41, %v1195_v13 }
 0x3a8   :  { %v1786_v43 = vadd.f32 %v1195_v13, %v805_v42  ;;  %841 = vadd.xlane.f32.xlu0 %v1783_v40 }
 0x3aa   :  { %843 = vadd.xlane.f32.xlu1 %v1786_v43 }
 0x3ac   :  { %845 = vadd.xlane.f32.xlu0 %v1789_v44 }
 0x3ae   :  { %847 = vadd.xlane.f32.xlu1 %v1792_v45 }
 0x41c   :  { %v822_v47 = vpop.xlane.xlu1 %821 }
 0x41d   :  { %v851_v48 = vsub.f32 %v822_v47, %v1748_v15  ;;  %v818_v38 = vpop.xlane.xlu0 %817 }
 0x41e   :  { %v849_v49 = vsub.f32 %v818_v38, %v1750_v16 }
 0x41f   :  { %885 = vrot.lane.b32.xlu1 %v851_v48, %s1505_s4 }
 0x420   :  { %881 = vrot.lane.b32.xlu0 %v849_v49, %s1505_s4  ;;  %v824_v52 = vpop.xlane.xlu1 %823 }
 0x421   :  { %v820_v50 = vpop.xlane.xlu0 %819  ;;  %v852_v57 = vsub.f32 %v824_v52, %v1754_v19 }
 0x422   :  { %v850_v51 = vsub.f32 %v820_v50, %v1756_v20 }
 0x424   :  { %883 = vrot.lane.b32.xlu1 %v850_v51, %s1505_s4 }
 0x425   :  { %v826_v56 = vpop.xlane.xlu0 %825 }
 0x426   :  { %v853_v58 = vsub.f32 %v826_v56, %v1760_v23 }
 0x427   :  { %v828_v59 = vpop.xlane.xlu1 %827 }
 0x428   :  { %887 = vrot.lane.b32.xlu1 %v852_v57, %s1505_s4  ;;  %889 = vrot.lane.b32.xlu0 %v853_v58, %s1505_s4  ;;  %v854_v61 = vsub.f32 %v828_v59, %v1762_v26 }
 0x429   :  { %v830_v60 = vpop.xlane.xlu0 %829 }
 0x42a   :  { %v855_v62 = vsub.f32 %v830_v60, %v1765_v27 }
 0x42b   :  { %v832_v63 = vpop.xlane.xlu1 %831 }
 0x42c   :  { %891 = vrot.lane.b32.xlu1 %v854_v61, %s1505_s4  ;;  %893 = vrot.lane.b32.xlu0 %v855_v62, %s1505_s4  ;;  %v856_v53 = vsub.f32 %v832_v63, %v1768_v28 }
 0x42d   :  { %v834_v0 = vpop.xlane.xlu0 %833 }
 0x42e   :  { %v857_v1 = vsub.f32 %v834_v0, %v1771_v31 }
 0x42f   :  { %v836_v2 = vpop.xlane.xlu1 %835 }
 0x430   :  { %895 = vrot.lane.b32.xlu1 %v856_v53, %s1505_s4  ;;  %897 = vrot.lane.b32.xlu0 %v857_v1, %s1505_s4  ;;  %v858_v3 = vsub.f32 %v836_v2, %v1774_v34 }
 0x431   :  { %v838_v55 = vpop.xlane.xlu0 %837 }
 0x432   :  { %v859_v4 = vsub.f32 %v838_v55, %v1777_v35 }
 0x433   :  { %v840_v5 = vpop.xlane.xlu1 %839 }
 0x434   :  { %899 = vrot.lane.b32.xlu1 %v858_v3, %s1505_s4  ;;  %901 = vrot.lane.b32.xlu0 %v859_v4, %s1505_s4  ;;  %v860_v7 = vsub.f32 %v840_v5, %v1780_v36 }
 0x435   :  { %v842_v6 = vpop.xlane.xlu0 %841 }
 0x436   :  { %v861_v8 = vsub.f32 %v842_v6, %v1783_v40 }
 0x437   :  { %v844_v9 = vpop.xlane.xlu1 %843 }
 0x438   :  { %903 = vrot.lane.b32.xlu1 %v860_v7, %s1505_s4  ;;  %905 = vrot.lane.b32.xlu0 %v861_v8, %s1505_s4  ;;  %v862_v11 = vsub.f32 %v844_v9, %v1786_v43 }
 0x439   :  { %v846_v10 = vpop.xlane.xlu0 %845 }
 0x43a   :  { %v863_v12 = vsub.f32 %v846_v10, %v1789_v44 }
 0x43b   :  { %v848_v13 = vpop.xlane.xlu1 %847 }
 0x43c   :  { %907 = vrot.lane.b32.xlu1 %v862_v11, %s1505_s4  ;;  %909 = vrot.lane.b32.xlu0 %v863_v12, %s1505_s4  ;;  %v864_v14 = vsub.f32 %v848_v13, %v1792_v45 }
 0x440   :  { %911 = vrot.lane.b32.xlu1 %v864_v14, %s1505_s4 }
 0x444   :  { %973 = vperm.xlu1 %1402, %v1750_v16  }
 0x448   :  { %978 = vperm.xlu1 %1402, %v1756_v20  }
 0x44c   :  { %983 = vperm.xlu1 %1402, %v1748_v15  }
 0x450   :  { %988 = vperm.xlu1 %1402, %v1754_v19  }
 0x454   :  { %993 = vperm.xlu1 %1402, %v1760_v23  }
 0x458   :  { %998 = vperm.xlu1 %1402, %v1762_v26  }
 0x45c   :  { %1003 = vperm.xlu1 %1402, %v1765_v27  }
 0x460   :  { %1013 = vperm.xlu1 %1402, %v1771_v31  }
 0x464   :  { %1018 = vperm.xlu1 %1402, %v1774_v34  }
 0x468   :  { %1023 = vperm.xlu1 %1402, %v1777_v35  }
 0x46c   :  { %1028 = vperm.xlu1 %1402, %v1780_v36  }
 0x470   :  { %1033 = vperm.xlu1 %1402, %v1783_v40  }
 0x474   :  { %1038 = vperm.xlu1 %1402, %v1786_v43  }
 0x478   :  { %1043 = vperm.xlu1 %1402, %v1789_v44  }
 0x47c   :  { %1048 = vperm.xlu1 %1402, %v1792_v45  }
 0x491   :  { %v886_v54 = vpop.permute.xlu1 %885 }
 0x492   :  { %v882_v17 = vpop.permute.xlu0 %881  ;;  %v933_v25 = vsel %vm929_vm1, %v886_v54, 0.0 }
 0x493   :  { %v930_v21 = vsel %vm929_vm1, %v882_v17, 0.0 }
 0x496   :  { %v884_v18 = vpop.permute.xlu1 %883 }
 0x497   :  { %v931_v22 = vsel %vm929_vm1, %v884_v18, 0.0 }
 0x498   :  { %v932_v24 = vadd.f32 %v931_v22, %v930_v21 }
 0x49a   :  { %v888_v29 = vpop.permute.xlu1 %887  ;;  %v934_v30 = vadd.f32 %v933_v25, %v932_v24  ;;  %v890_v32 = vpop.permute.xlu0 %889 }
 0x49b   :  { %v935_v33 = vsel %vm929_vm1, %v888_v29, 0.0  ;;  %v937_v39 = vsel %vm929_vm1, %v890_v32, 0.0 }
 0x49c   :  { %v936_v37 = vadd.f32 %v935_v33, %v934_v30 }
 0x49e   :  { %v938_v41 = vadd.f32 %v937_v39, %v936_v37  ;;  %v892_v42 = vpop.permute.xlu1 %891  ;;  %v894_v46 = vpop.permute.xlu0 %893 }
 0x49f   :  { %v939_v47 = vsel %vm929_vm1, %v892_v42, 0.0  ;;  %v941_v38 = vsel %vm929_vm1, %v894_v46, 0.0 }
 0x4a0   :  { %v940_v48 = vadd.f32 %v939_v47, %v938_v41 }
 0x4a2   :  { %v942_v49 = vadd.f32 %v941_v38, %v940_v48  ;;  %v896_v50 = vpop.permute.xlu1 %895  ;;  %v898_v51 = vpop.permute.xlu0 %897 }
 0x4a3   :  { %v943_v52 = vsel %vm929_vm1, %v896_v50, 0.0  ;;  %v945_v57 = vsel %vm929_vm1, %v898_v51, 0.0  ;;  %v1084_v50 = vlaneseq }
 0x4a4   :  { %v944_v56 = vadd.f32 %v943_v52, %v942_v49 }
 0x4a6   :  { %v946_v58 = vadd.f32 %v945_v57, %v944_v56  ;;  %v900_v59 = vpop.permute.xlu1 %899  ;;  %v902_v60 = vpop.permute.xlu0 %901  ;;  %v1863_v57 = vand.u32 127, %v1084_v50 }
 0x4a7   :  { %v947_v61 = vsel %vm929_vm1, %v900_v59, 0.0  ;;  %v949_v63 = vsel %vm929_vm1, %v902_v60, 0.0 }
 0x4a8   :  { %v948_v62 = vadd.f32 %v947_v61, %v946_v58  ;;  %vm1086_vm2 = vcmp.lt.s32.totalorder %v1863_v57, 4 }
 0x4aa   :  { %v950_v0 = vadd.f32 %v949_v63, %v948_v62  ;;  %v904_v53 = vpop.permute.xlu1 %903  ;;  %v906_v1 = vpop.permute.xlu0 %905 }
 0x4ab   :  { %v951_v2 = vsel %vm929_vm1, %v904_v53, 0.0  ;;  %v953_v3 = vsel %vm929_vm1, %v906_v1, 0.0 }
 0x4ac   :  { %v952_v55 = vadd.f32 %v951_v2, %v950_v0 }
 0x4ae   :  { %v954_v4 = vadd.f32 %v953_v3, %v952_v55  ;;  %v908_v5 = vpop.permute.xlu1 %907  ;;  %v910_v6 = vpop.permute.xlu0 %909 }
 0x4af   :  { %v955_v7 = vsel %vm929_vm1, %v908_v5, 0.0  ;;  %v957_v9 = vsel %vm929_vm1, %v910_v6, 0.0 }
 0x4b0   :  { %v956_v8 = vadd.f32 %v955_v7, %v954_v4 }
 0x4b2   :  { %v958_v10 = vadd.f32 %v957_v9, %v956_v8  ;;  %v912_v11 = vpop.permute.xlu1 %911 }
 0x4b3   :  { %v959_v12 = vsel %vm929_vm1, %v912_v11, 0.0 }
 0x4b4   :  { %v960_v13 = vadd.f32 %v959_v12, %v958_v10 }
 0x4b6   :  { %961 = vadd.xlane.f32.xlu0 %v960_v13 }
 0x4c3   :  { %v974_v14 = vpop.permute.xlu1 %973 }
 0x4c4   :  { %v1051_v51 = vadd.f32 %v974_v14, %v1750_v16 }
 0x4c7   :  { %v979_v54 = vpop.permute.xlu1 %978 }
 0x4c8   :  { %v1052_v52 = vadd.f32 %v979_v54, %v1756_v20 }
 0x4cb   :  { %v984_v17 = vpop.permute.xlu1 %983 }
 0x4cc   :  { %1008 = vperm.xlu0 %1403, %v1768_v28   ;;  %v1053_v56 = vadd.f32 %v984_v17, %v1748_v15 }
 0x4cf   :  { %v989_v18 = vpop.permute.xlu1 %988 }
 0x4d0   :  { %v1054_v58 = vadd.f32 %v989_v18, %v1754_v19 }
 0x4d3   :  { %v994_v24 = vpop.permute.xlu1 %993 }
 0x4d4   :  { %v1055_v59 = vadd.f32 %v994_v24, %v1760_v23 }
 0x4d7   :  { %v999_v32 = vpop.permute.xlu1 %998 }
 0x4d8   :  { %v1056_v60 = vadd.f32 %v999_v32, %v1762_v26 }
 0x4db   :  { %v1004_v39 = vpop.permute.xlu1 %1003 }
 0x4dc   :  { %v1057_v61 = vadd.f32 %v1004_v39, %v1765_v27 }
 0x4df   :  { %v1014_v41 = vpop.permute.xlu1 %1013 }
 0x4e0   :  { %v1059_v16 = vadd.f32 %v1014_v41, %v1771_v31 }
 0x4e3   :  { %v1019_v42 = vpop.permute.xlu1 %1018 }
 0x4e4   :  { %v1060_v20 = vadd.f32 %v1019_v42, %v1774_v34 }
 0x4e7   :  { %v1024_v46 = vpop.permute.xlu1 %1023 }
 0x4e8   :  { %v1061_v15 = vadd.f32 %v1024_v46, %v1777_v35 }
 0x4eb   :  { %v1029_v47 = vpop.permute.xlu1 %1028 }
 0x4ec   :  { %v1062_v53 = vadd.f32 %v1029_v47, %v1780_v36 }
 0x4ef   :  { %v1034_v48 = vpop.permute.xlu1 %1033 }
 0x4f0   :  { %v1063_v19 = vadd.f32 %v1034_v48, %v1783_v40 }
 0x4f3   :  { %v1039_v38 = vpop.permute.xlu1 %1038 }
 0x4f4   :  { %v1064_v23 = vadd.f32 %v1039_v38, %v1786_v43 }
 0x4f7   :  { %v1044_v49 = vpop.permute.xlu1 %1043 }
 0x4f8   :  { %v1065_v27 = vadd.f32 %v1044_v49, %v1789_v44 }
 0x4fb   :  { %v1049_v62 = vpop.permute.xlu1 %1048 }
 0x4fc   :  { %v1066_v1 = vadd.f32 %v1049_v62, %v1792_v45 }
 0x543   :  { %v962_v21 = vpop.xlane.xlu0 %961 }
 0x544   :  { %v963_v22 = vrot.slane %v962_v21, 4 }
 0x546   :  { %v964_v25 = vadd.f32 %v963_v22, %v962_v21 }
 0x548   :  { %v965_v29 = vrot.slane %v964_v25, 2 }
 0x54a   :  { %v966_v30 = vadd.f32 %v965_v29, %v964_v25 }
 0x54b   :  { %v1009_v63 = vpop.permute.xlu0 %1008 }
 0x54c   :  { %v967_v33 = vrot.slane %v966_v30, 1  ;;  %v1058_v2 = vadd.f32 %v1009_v63, %v1768_v28 }
 0x54e   :  { %v968_v37 = vadd.f32 %v967_v33, %v966_v30 }
 0x550   :  { %1391 = vpush %v968_v37 }
 0x581   :  { %s1392_s0 = spop %1391 }
 0x582   :  { %v970_v0 = vstv %s1392_s0 }
 0x583   :  { %v1067_v26 = vmul.f32 0.001953125, %v970_v0  ;;  %1119 = vst [vmem:[#allocation6] sm:$0xff] %v970_v0 }
 0x584   :  { %1462 = shalt.err (!%p1459_p12)
}
 0x585   :  { %s1463_s10 = scalar_lea.hbm %s1948_s6, 128 }
 0x586   :  { %p1464_p13 = scmp.ne.s32.totalorder %s1948_s6, %s1463_s10  ;;  %p1467_p0 = scmp.lt.u32.totalorder %s1463_s10, %s1948_s6 }
 0x588   :  { %p1469_p1 = pnand %p1467_p0, %p1464_p13 }
 0x58a   :  { %1472 = shalt.err (!%p1469_p1)
}
 0x58b   :  { %1141 = dma.vmem_to_hbm [thread:$0]  %s1139_s30, 128, %s1948_s6, [#allocation7]   ;;  %v1068_v28 = vsub.f32 %v1051_v51, %v1067_v26  ;;  %v1069_v31 = vsub.f32 %v1052_v52, %v1067_v26  ;;  %v1070_v34 = vsub.f32 %v1053_v56, %v1067_v26  ;;  %v1071_v35 = vsub.f32 %v1054_v58, %v1067_v26 }
 0x58c   :  { %v1072_v36 = vsub.f32 %v1055_v59, %v1067_v26  ;;  %v1073_v40 = vsub.f32 %v1056_v60, %v1067_v26  ;;  %v1074_v43 = vsub.f32 %v1057_v61, %v1067_v26  ;;  %v1075_v44 = vsub.f32 %v1058_v2, %v1067_v26  ;;  %s1507_s17 = smov [#allocation5]  }
 0x58d   :  { %v1076_v45 = vsub.f32 %v1059_v16, %v1067_v26  ;;  %v1077_v55 = vsub.f32 %v1060_v20, %v1067_v26  ;;  %v1078_v3 = vsub.f32 %v1061_v15, %v1067_v26  ;;  %v1079_v4 = vsub.f32 %v1062_v53, %v1067_v26  ;;  %s1125_s18 = sshll.u32 %s1507_s17, 4  ;;  %s1907_s18 = int_to_ptr.vmem [resolvable:$true] %s1125_s18 }
 0x58e   :  { %v1080_v5 = vsub.f32 %v1063_v19, %v1067_v26  ;;  %v1081_v6 = vsub.f32 %v1064_v23, %v1067_v26  ;;  %v1082_v7 = vsub.f32 %v1065_v27, %v1067_v26  ;;  %v1083_v8 = vsub.f32 %v1066_v1, %v1067_v26  ;;  %s1473_s6 = scalar_lea.vmem %s1907_s18, 2048  ;;  %p1478_p3 = scmp.lt.s32.totalorder %s1907_s18, %s1907_s18 }
 0x58f   :  { %v1087_v9 = vsel %vm1086_vm2, %v1068_v28, 0.0  ;;  %v1088_v10 = vsel %vm1086_vm2, %v1069_v31, 0.0  ;;  %v1089_v11 = vsel %vm1086_vm2, %v1070_v34, 0.0  ;;  %v1090_v12 = vsel %vm1086_vm2, %v1071_v35, 0.0  ;;  %p1474_p2 = scmp.ne.s32.totalorder %s1907_s18, %s1473_s6  ;;  %p1479_p4 = scmp.lt.s32.totalorder %s1473_s6, %s1473_s6 }
 0x590   :  { %v1091_v13 = vsel %vm1086_vm2, %v1072_v36, 0.0  ;;  %v1092_v14 = vsel %vm1086_vm2, %v1073_v40, 0.0  ;;  %v1093_v54 = vsel %vm1086_vm2, %v1074_v43, 0.0  ;;  %v1094_v17 = vsel %vm1086_vm2, %v1075_v44, 0.0  ;;  %1103 = vst [vmem:[#allocation5] sm:$0xff] %v1087_v9  ;;  %1104 = vst [vmem:[#allocation5 + $0x8] sm:$0xff] %v1088_v10 }
 0x591   :  { %1105 = vst [vmem:[#allocation5 + $0x10] sm:$0xff] %v1089_v11  ;;  %1106 = vst [vmem:[#allocation5 + $0x18] sm:$0xff] %v1090_v12  ;;  %v1095_v18 = vsel %vm1086_vm2, %v1076_v45, 0.0  ;;  %v1096_v21 = vsel %vm1086_vm2, %v1077_v55, 0.0  ;;  %v1097_v22 = vsel %vm1086_vm2, %v1078_v3, 0.0  ;;  %v1098_v24 = vsel %vm1086_vm2, %v1079_v4, 0.0  ;;  %p1480_p5 = por %p1479_p4, %p1478_p3 }
 0x592   :  { %1107 = vst [vmem:[#allocation5 + $0x20] sm:$0xff] %v1091_v13  ;;  %1108 = vst [vmem:[#allocation5 + $0x28] sm:$0xff] %v1092_v14  ;;  %v1099_v25 = vsel %vm1086_vm2, %v1080_v5, 0.0  ;;  %v1100_v29 = vsel %vm1086_vm2, %v1081_v6, 0.0  ;;  %v1101_v30 = vsel %vm1086_vm2, %v1082_v7, 0.0  ;;  %v1102_v32 = vsel %vm1086_vm2, %v1083_v8, 0.0 }
 0x593   :  { %1109 = vst [vmem:[#allocation5 + $0x30] sm:$0xff] %v1093_v54  ;;  %1110 = vst [vmem:[#allocation5 + $0x38] sm:$0xff] %v1094_v17  ;;  %p1481_p6 = pnand %p1480_p5, %p1474_p2 }
 0x594   :  { %1111 = vst [vmem:[#allocation5 + $0x40] sm:$0xff] %v1095_v18  ;;  %1112 = vst [vmem:[#allocation5 + $0x48] sm:$0xff] %v1096_v21 }
 0x595   :  { %1113 = vst [vmem:[#allocation5 + $0x50] sm:$0xff] %v1097_v22  ;;  %1114 = vst [vmem:[#allocation5 + $0x58] sm:$0xff] %v1098_v24 }
 0x596   :  { %1115 = vst [vmem:[#allocation5 + $0x60] sm:$0xff] %v1099_v25  ;;  %1116 = vst [vmem:[#allocation5 + $0x68] sm:$0xff] %v1100_v29 }
 0x597   :  { %1117 = vst [vmem:[#allocation5 + $0x70] sm:$0xff] %v1101_v30  ;;  %1118 = vst [vmem:[#allocation5 + $0x78] sm:$0xff] %v1102_v32 }
 0x598   :  { %1484 = shalt.err (!%p1481_p6)
}
 0x599   :  { %s1485_s1 = scalar_lea.hbm %s1947_s5, 2048 }
 0x59a   :  { %p1486_p7 = scmp.ne.s32.totalorder %s1947_s5, %s1485_s1  ;;  %p1489_p8 = scmp.lt.u32.totalorder %s1485_s1, %s1947_s5 }
 0x59c   :  { %p1491_p9 = pnand %p1489_p8, %p1486_p7 }
 0x59e   :  { %1494 = shalt.err (!%p1491_p9)
}
 0x59f   :  { %s1508_s2 = smov 128   ;;  %s1509_s24 = smov 8  }
 0x5a0   :  { %1131 = dma.vmem_to_hbm [thread:$0]  %s1907_s18, 2048, %s1947_s5, [#allocation4], %s1508_s2, %s1508_s2, %s1509_s24  }
 0x5a1   :  { %1497 = dma.done.wait [#allocation4], 2048  }
 0x5a2   :  { %1498 = vsyncadd [#allocation4], 4294965248 }
 0x5a3   :  { %1499 = dma.done.wait [#allocation7], 128  }
 0x5a4   :  { %1500 = vsyncadd [#allocation7], 4294967168 }
 0x5a5   :  { %1148 = vsyncpa [#allocation3], 1 }
 0x5a6   :  { %1149 = vsyncpa [#allocation4], 1 }
 0x5a7   :  { %1150 = vsyncpa [#allocation7], 1 }

</bundles_post_ra>
